<compile_context>
chip_gen: v7x
topology: tpu7x:2x2x1
jax: 0.10.0
libtpu: 0.0.40
codegen_flags: <defaults>
</compile_context>

<pallas_src>
import functools

import jax
import jax.numpy as jnp
from jax.experimental import pallas as pl
from jax.experimental.pallas import tpu as pltpu


def _round_up(x, m):
    return ((x + m - 1) // m) * m


# ----------------------------------------------------------------------------
# Pallas kernel: fused MultiTargetPredictionHead
# ----------------------------------------------------------------------------
def _fused_head_kernel(x_ref, w1_ref, b1_ref, wh_ref, bh_ref, wo_ref, bo_ref,
                       out_ref, *, num_hidden_layers):
    # x_ref : [Bblk, D_pad]        (bf16)
    # w1_ref: [D_pad, TH_pad]      (bf16)   b1_ref: [1, TH_pad]        (f32)
    # wh_ref: [max(L-1,1), TH_pad, TH_pad] (bf16, block-diagonal)
    # bh_ref: [max(L-1,1), 1, TH_pad]      (f32)
    # wo_ref: [TH_pad, T_pad]      (bf16)   bo_ref: [1, T_pad]         (f32)
    # out_ref: [Bblk, T_pad]       (f32, lane-dense)
    cdt = w1_ref.dtype

    # fused first hidden layer: one wide matmul over all heads
    h = jnp.dot(x_ref[...], w1_ref[...], preferred_element_type=jnp.float32)
    h = jnp.maximum(h + b1_ref[...], 0.0)

    # fused hidden layers: block-diagonal weights, one matmul per layer
    for l in range(num_hidden_layers - 1):
        h = jnp.dot(h.astype(cdt), wh_ref[l], preferred_element_type=jnp.float32)
        h = jnp.maximum(h + bh_ref[l], 0.0)

    # fused output layer: stacked [TH_pad, T_pad] weight, no in-kernel concat
    y = jnp.dot(h.astype(cdt), wo_ref[...], preferred_element_type=jnp.float32)
    out_ref[...] = (y + bo_ref[...]).astype(out_ref.dtype)


def multi_head_mlp(feature_list, fused):
    """Fused multi-target prediction head.

    `feature_list` is a list of [B, d_i] f32 arrays whose concatenation is the
    MLP input; they are written directly into the zero-padded bf16 input slab
    (no separate concatenate round-trip). Returns [B, num_targets] f32.
    """
    B = feature_list[0].shape[0]
    D_pad, TH_pad = fused["w1"].shape
    T_pad = fused["wo"].shape[1]
    Lm1p = fused["wh"].shape[0]
    L = fused["num_hidden_layers"]
    T = fused["num_targets"]
    cdt = fused["w1"].dtype

    # pad batch to a full bf16 sublane tile; pad features to D_pad lanes
    block_b = 16
    B_pad = _round_up(max(B, block_b), block_b)
    x_pad = jnp.zeros((B_pad, D_pad), cdt)
    off = 0
    for f in feature_list:
        d = f.shape[1]
        x_pad = x_pad.at[:B, off:off + d].set(f.astype(cdt))
        off += d

    grid = (B_pad // block_b,)
    kernel = functools.partial(_fused_head_kernel, num_hidden_layers=L)
    out = pl.pallas_call(
        kernel,
        out_shape=jax.ShapeDtypeStruct((B_pad, T_pad), jnp.float32),
        grid=grid,
        in_specs=[
            pl.BlockSpec((block_b, D_pad), lambda i: (i, 0)),
            pl.BlockSpec((D_pad, TH_pad), lambda i: (0, 0)),
            pl.BlockSpec((1, TH_pad), lambda i: (0, 0)),
            pl.BlockSpec((Lm1p, TH_pad, TH_pad), lambda i: (0, 0, 0)),
            pl.BlockSpec((Lm1p, 1, TH_pad), lambda i: (0, 0, 0)),
            pl.BlockSpec((TH_pad, T_pad), lambda i: (0, 0)),
            pl.BlockSpec((1, T_pad), lambda i: (0, 0)),
        ],
        out_specs=pl.BlockSpec((block_b, T_pad), lambda i: (i, 0)),
        compiler_params=pltpu.CompilerParams(
            dimension_semantics=("parallel",)),
    )(x_pad, fused["w1"], fused["b1"], fused["wh"], fused["bh"],
      fused["wo"], fused["bo"])
    return out[:B, :T]


# ----------------------------------------------------------------------------
# Parameter construction (matches module __init__ shapes) + one-time fusion
# ----------------------------------------------------------------------------
def init_params(key, *, input_dim, hidden_dim, num_hidden_layers, output_dim):
    """Per-head weights for `output_dim` EnhancedPredictionMLP heads.

    Linear weights are stored as [in_dim, out_dim] (transpose of PyTorch's
    [out_dim, in_dim]) so y = x @ W + b.
    """
    T, H, D, L = output_dim, hidden_dim, input_dim, num_hidden_layers
    ks = jax.random.split(key, 6)
    scale = 0.1
    w1 = scale * jax.random.normal(ks[0], (T, D, H), jnp.float32)
    b1 = scale * jax.random.normal(ks[1], (T, 1, H), jnp.float32)
    wh = scale * jax.random.normal(ks[2], (T, max(L - 1, 0), H, H), jnp.float32)
    bh = scale * jax.random.normal(ks[3], (T, max(L - 1, 0), 1, H), jnp.float32)
    wo = scale * jax.random.normal(ks[4], (T, H, 1), jnp.float32)
    bo = scale * jax.random.normal(ks[5], (T, 1, 1), jnp.float32)
    return dict(w1=w1, b1=b1, wh=wh, bh=bh, wo=wo, bo=bo)


def build_fused_head_params(params, *, compute_dtype=jnp.bfloat16):
    """Precompute padded, fused (concatenated / block-diagonal) head weights."""
    w1, b1 = params["w1"], params["b1"]
    wh, bh = params["wh"], params["bh"]
    wo, bo = params["wo"], params["bo"]
    T, D, H = w1.shape
    Lm1 = wh.shape[1]
    L = Lm1 + 1
    TH = T * H
    D_pad = _round_up(D, 128)
    TH_pad = _round_up(TH, 128)
    T_pad = _round_up(T, 128)
    Lm1p = max(Lm1, 1)

    # first layer: concat heads along the output dim -> [D_pad, TH_pad]
    w1_cat = jnp.zeros((D_pad, TH_pad), jnp.float32)
    w1_cat = w1_cat.at[:D, :TH].set(jnp.transpose(w1, (1, 0, 2)).reshape(D, TH))
    b1_cat = jnp.zeros((1, TH_pad), jnp.float32).at[0, :TH].set(b1.reshape(TH))

    # hidden layers: block-diagonal [TH_pad, TH_pad] per layer
    wh_bd = jnp.zeros((Lm1p, TH_pad, TH_pad), jnp.float32)
    bh_cat = jnp.zeros((Lm1p, 1, TH_pad), jnp.float32)
    for l in range(Lm1):
        for t in range(T):
            wh_bd = wh_bd.at[l, t * H:(t + 1) * H, t * H:(t + 1) * H].set(wh[t, l])
        bh_cat = bh_cat.at[l, 0, :TH].set(bh[:, l].reshape(TH))

    # output layer: stacked [TH_pad, T_pad] weight (column t <- wo[t])
    wo_cat = jnp.zeros((TH_pad, T_pad), jnp.float32)
    for t in range(T):
        wo_cat = wo_cat.at[t * H:(t + 1) * H, t].set(wo[t, :, 0])
    bo_cat = jnp.zeros((1, T_pad), jnp.float32).at[0, :T].set(bo[:, 0, 0])

    return dict(
        w1=w1_cat.astype(compute_dtype), b1=b1_cat,
        wh=wh_bd.astype(compute_dtype), bh=bh_cat,
        wo=wo_cat.astype(compute_dtype), bo=bo_cat,
        num_hidden_layers=L, num_targets=T, input_dim=D,
    )


# ----------------------------------------------------------------------------
# Full MoleculePredictionModel.forward
# ----------------------------------------------------------------------------
def molecule_prediction_forward(params, fused_head, pos0, pos1, pos2, z0, z1, z2,
                                batch_mapping, xtb_features,
                                *, node_dim, max_num_atoms, num_batches,
                                num_xtb_features, use_xtb_features=True):
    del pos1, pos2, z1, z2  # only consumed by the (external) base model

    # --- base_model surrogate (plain JAX glue; see TODO at top of file) ---
    atom_emb = params["atom_embedding"][z0]                       # [N, node_dim]
    pos_feat = jnp.tanh(pos0 @ params["pos_proj"])                # [N, node_dim]
    node_feat = atom_emb + pos_feat
    graph_embeddings = jax.ops.segment_sum(
        node_feat, batch_mapping, num_segments=num_batches)       # [B, node_dim]

    # --- to_dense_batch(zeros, batch_mapping, 0, max_num_atoms) ---
    # dummy_nodes are all-zero in the reference module, so the dense batch is
    # all-zero as well (faithful to the PyTorch code).
    node_embeddings_dense = jnp.zeros(
        (num_batches, max_num_atoms, node_dim), jnp.float32)

    # --- combine graph embeddings with xtb features ---
    if use_xtb_features and xtb_features is not None:
        if xtb_features.shape[1] > num_xtb_features:
            features_to_use = xtb_features[:, :num_xtb_features]
        elif xtb_features.shape[1] < num_xtb_features:
            # guard: zero-pad so the width matches the head's input_dim
            pad = num_xtb_features - xtb_features.shape[1]
            features_to_use = jnp.pad(xtb_features, ((0, 0), (0, pad)))
        else:
            features_to_use = xtb_features
        feature_list = [graph_embeddings, features_to_use]
    else:
        feature_list = [graph_embeddings]

    # --- prediction MLP heads (fused Pallas kernel hot path) ---
    predictions = multi_head_mlp(feature_list, fused_head)

    return node_embeddings_dense, graph_embeddings, predictions


# ----------------------------------------------------------------------------
# Pure-JAX f32 per-head reference for the MLP heads (correctness check)
# ----------------------------------------------------------------------------
def multi_head_mlp_ref(x, w1, b1, wh, bh, wo, bo):
    T = w1.shape[0]
    L = wh.shape[1] + 1
    outs = []
    for t in range(T):
        h = jnp.maximum(x @ w1[t] + b1[t], 0.0)
        for l in range(L - 1):
            h = jnp.maximum(h @ wh[t, l] + bh[t, l], 0.0)
        outs.append(h @ wo[t] + bo[t])
    return jnp.concatenate(outs, axis=1)


if __name__ == "__main__":
    # Small, module-consistent shapes.
    num_batches = 2            # number of graphs in the batch
    num_atoms = 10             # total atoms across the batch
    max_num_atoms = 16
    node_dim = 32
    num_xtb_features = 2
    output_dim = 3             # number of prediction targets
    prediction_hidden_dim = 32
    prediction_hidden_layers = 3
    input_dim_for_mlp = node_dim + num_xtb_features

    key = jax.random.PRNGKey(0)
    k_param, k_emb, k_proj, k_pos, k_xtb = jax.random.split(key, 5)

    params = init_params(
        k_param,
        input_dim=input_dim_for_mlp,
        hidden_dim=prediction_hidden_dim,
        num_hidden_layers=prediction_hidden_layers,
        output_dim=output_dim,
    )
    # one-time fused/padded head weights (bf16 matmul operands, f32 biases)
    fused_head = build_fused_head_params(params, compute_dtype=jnp.bfloat16)

    # surrogate base-model parameters (deterministic)
    max_atomic_number = 16
    params["atom_embedding"] = 0.1 * jax.random.normal(
        k_emb, (max_atomic_number, node_dim), jnp.float32)
    params["pos_proj"] = 0.1 * jax.random.normal(
        k_proj, (3, node_dim), jnp.float32)

    # example inputs
    pos0 = jax.random.normal(k_pos, (num_atoms, 3), jnp.float32)
    pos1 = pos0 + 0.01
    pos2 = pos0 - 0.01
    z0 = jnp.array([1, 6, 6, 8, 1, 1, 7, 6, 1, 8], jnp.int32)
    z1 = z0
    z2 = z0
    batch_mapping = jnp.array([0, 0, 0, 0, 0, 1, 1, 1, 1, 1], jnp.int32)
    xtb_features = jax.random.normal(k_xtb, (num_batches, num_xtb_features),
                                     jnp.float32)

    node_dense, graph_emb, preds = molecule_prediction_forward(
        params, fused_head, pos0, pos1, pos2, z0, z1, z2, batch_mapping,
        xtb_features,
        node_dim=node_dim, max_num_atoms=max_num_atoms,
        num_batches=num_batches, num_xtb_features=num_xtb_features,
        use_xtb_features=True)
    jax.block_until_ready((node_dense, graph_emb, preds))

    # sanity-check the fused bf16 Pallas MLP against the per-head f32 reference
    combined = jnp.concatenate([graph_emb, xtb_features], axis=1)
    ref = multi_head_mlp_ref(combined, params["w1"], params["b1"],
                             params["wh"], params["bh"],
                             params["wo"], params["bo"])
    assert node_dense.shape == (num_batches, max_num_atoms, node_dim)
    assert graph_emb.shape == (num_batches, node_dim)
    assert preds.shape == (num_batches, output_dim)
    # bf16 matmul operands (f32 accumulation) -> loosened tolerance vs f32 ref
    assert jnp.allclose(preds, ref, atol=3e-2, rtol=3e-2), (preds, ref)

    print("KERNEL_OK")
</pallas_src>

<mosaic_0001>
module attributes {stable_mosaic.version = 11 : i64} {
  func.func @_fused_head_kernel(%arg0: i32, %arg1: memref<16x128xbf16, #tpu.memory_space<vmem>>, %arg2: memref<128x128xbf16, #tpu.memory_space<vmem>>, %arg3: memref<1x128xf32, #tpu.memory_space<vmem>>, %arg4: memref<2x128x128xbf16, #tpu.memory_space<vmem>>, %arg5: memref<2x1x128xf32, #tpu.memory_space<vmem>>, %arg6: memref<128x128xbf16, #tpu.memory_space<vmem>>, %arg7: memref<1x128xf32, #tpu.memory_space<vmem>>, %arg8: memref<16x128xf32, #tpu.memory_space<vmem>>) attributes {dimension_semantics = [#tpu.dimension_semantics<parallel>], iteration_bounds = array<i64: 1>, scalar_prefetch = 0 : i64, scratch_operands = 0 : i64, tpu.core_type = #tpu.core_type<tc>, window_params = [{transform_indices = @transform_0, window_bounds = array<i64: 16, 128>}, {pipeline_mode = #tpu.pipeline_mode<synchronous>, transform_indices = @transform_1, window_bounds = array<i64: 128, 128>}, {pipeline_mode = #tpu.pipeline_mode<synchronous>, transform_indices = @transform_2, window_bounds = array<i64: 1, 128>}, {pipeline_mode = #tpu.pipeline_mode<synchronous>, transform_indices = @transform_3, window_bounds = array<i64: 2, 128, 128>}, {pipeline_mode = #tpu.pipeline_mode<synchronous>, transform_indices = @transform_4, window_bounds = array<i64: 2, 1, 128>}, {pipeline_mode = #tpu.pipeline_mode<synchronous>, transform_indices = @transform_5, window_bounds = array<i64: 128, 128>}, {pipeline_mode = #tpu.pipeline_mode<synchronous>, transform_indices = @transform_6, window_bounds = array<i64: 1, 128>}, {transform_indices = @transform_7, window_bounds = array<i64: 16, 128>}]} {
    %c0 = arith.constant 0 : index
    %c0_0 = arith.constant 0 : index
    %0 = vector.load %arg1[%c0, %c0_0] : memref<16x128xbf16, #tpu.memory_space<vmem>>, vector<16x128xbf16>
    %c0_1 = arith.constant 0 : index
    %c0_2 = arith.constant 0 : index
    %1 = vector.load %arg2[%c0_1, %c0_2] : memref<128x128xbf16, #tpu.memory_space<vmem>>, vector<128x128xbf16>
    %cst = arith.constant dense<0.000000e+00> : vector<16x128xf32>
    %2 = tpu.matmul %0, %1, %cst {dimension_numbers = #tpu.dot_dimension_numbers<[1], [0], [0], [1], [0, 0, 1, 1], [], []>} : vector<16x128xbf16>, vector<128x128xbf16>, vector<16x128xf32> -> vector<16x128xf32>
    %c0_3 = arith.constant 0 : index
    %c0_4 = arith.constant 0 : index
    %3 = vector.load %arg3[%c0_3, %c0_4] : memref<1x128xf32, #tpu.memory_space<vmem>>, vector<1x128xf32>
    %4 = vector.broadcast %3 : vector<1x128xf32> to vector<16x128xf32>
    %5 = arith.addf %2, %4 : vector<16x128xf32>
    %cst_5 = arith.constant 0.000000e+00 : f32
    %6 = vector.broadcast %cst_5 : f32 to vector<16x128xf32>
    %7 = arith.maximumf %5, %6 : vector<16x128xf32>
    %8 = arith.truncf %7 : vector<16x128xf32> to vector<16x128xbf16>
    %c0_6 = arith.constant 0 : index
    %c0_7 = arith.constant 0 : index
    %c0_8 = arith.constant 0 : index
    %9 = vector.load %arg4[%c0_6, %c0_7, %c0_8] : memref<2x128x128xbf16, #tpu.memory_space<vmem>>, vector<1x128x128xbf16>
    %10 = vector.shape_cast %9 : vector<1x128x128xbf16> to vector<128x128xbf16>
    %cst_9 = arith.constant dense<0.000000e+00> : vector<16x128xf32>
    %11 = tpu.matmul %8, %10, %cst_9 {dimension_numbers = #tpu.dot_dimension_numbers<[1], [0], [0], [1], [0, 0, 1, 1], [], []>} : vector<16x128xbf16>, vector<128x128xbf16>, vector<16x128xf32> -> vector<16x128xf32>
    %c0_10 = arith.constant 0 : index
    %c0_11 = arith.constant 0 : index
    %c0_12 = arith.constant 0 : index
    %12 = vector.load %arg5[%c0_10, %c0_11, %c0_12] : memref<2x1x128xf32, #tpu.memory_space<vmem>>, vector<1x1x128xf32>
    %13 = vector.shape_cast %12 : vector<1x1x128xf32> to vector<1x128xf32>
    %14 = vector.broadcast %13 : vector<1x128xf32> to vector<16x128xf32>
    %15 = arith.addf %11, %14 : vector<16x128xf32>
    %cst_13 = arith.constant 0.000000e+00 : f32
    %16 = vector.broadcast %cst_13 : f32 to vector<16x128xf32>
    %17 = arith.maximumf %15, %16 : vector<16x128xf32>
    %18 = arith.truncf %17 : vector<16x128xf32> to vector<16x128xbf16>
    %c1 = arith.constant 1 : index
    %c0_14 = arith.constant 0 : index
    %c0_15 = arith.constant 0 : index
    %19 = vector.load %arg4[%c1, %c0_14, %c0_15] : memref<2x128x128xbf16, #tpu.memory_space<vmem>>, vector<1x128x128xbf16>
    %20 = vector.shape_cast %19 : vector<1x128x128xbf16> to vector<128x128xbf16>
    %cst_16 = arith.constant dense<0.000000e+00> : vector<16x128xf32>
    %21 = tpu.matmul %18, %20, %cst_16 {dimension_numbers = #tpu.dot_dimension_numbers<[1], [0], [0], [1], [0, 0, 1, 1], [], []>} : vector<16x128xbf16>, vector<128x128xbf16>, vector<16x128xf32> -> vector<16x128xf32>
    %c1_17 = arith.constant 1 : index
    %c0_18 = arith.constant 0 : index
    %c0_19 = arith.constant 0 : index
    %22 = vector.load %arg5[%c1_17, %c0_18, %c0_19] : memref<2x1x128xf32, #tpu.memory_space<vmem>>, vector<1x1x128xf32>
    %23 = vector.shape_cast %22 : vector<1x1x128xf32> to vector<1x128xf32>
    %24 = vector.broadcast %23 : vector<1x128xf32> to vector<16x128xf32>
    %25 = arith.addf %21, %24 : vector<16x128xf32>
    %cst_20 = arith.constant 0.000000e+00 : f32
    %26 = vector.broadcast %cst_20 : f32 to vector<16x128xf32>
    %27 = arith.maximumf %25, %26 : vector<16x128xf32>
    %28 = arith.truncf %27 : vector<16x128xf32> to vector<16x128xbf16>
    %c0_21 = arith.constant 0 : index
    %c0_22 = arith.constant 0 : index
    %29 = vector.load %arg6[%c0_21, %c0_22] : memref<128x128xbf16, #tpu.memory_space<vmem>>, vector<128x128xbf16>
    %cst_23 = arith.constant dense<0.000000e+00> : vector<16x128xf32>
    %30 = tpu.matmul %28, %29, %cst_23 {dimension_numbers = #tpu.dot_dimension_numbers<[1], [0], [0], [1], [0, 0, 1, 1], [], []>} : vector<16x128xbf16>, vector<128x128xbf16>, vector<16x128xf32> -> vector<16x128xf32>
    %c0_24 = arith.constant 0 : index
    %c0_25 = arith.constant 0 : index
    %31 = vector.load %arg7[%c0_24, %c0_25] : memref<1x128xf32, #tpu.memory_space<vmem>>, vector<1x128xf32>
    %32 = vector.broadcast %31 : vector<1x128xf32> to vector<16x128xf32>
    %33 = arith.addf %30, %32 : vector<16x128xf32>
    %c0_26 = arith.constant 0 : index
    %c0_27 = arith.constant 0 : index
    %34 = vector.load %arg8[%c0_26, %c0_27] : memref<16x128xf32, #tpu.memory_space<vmem>>, vector<16x128xf32>
    tpu.vector_store %arg8[%c0_26, %c0_27], %33 {strides = array<i32>} : memref<16x128xf32, #tpu.memory_space<vmem>>, vector<16x128xf32>,
    return
  }
  func.func @transform_0(%arg0: i32) -> (i32, i32) {
    %c0_i32 = arith.constant 0 : i32
    %c0_i32_0 = arith.constant 0 : i32
    return %arg0, %c0_i32 : i32, i32
  }
  func.func @transform_1(%arg0: i32) -> (i32, i32) {
    %c0_i32 = arith.constant 0 : i32
    %c0_i32_0 = arith.constant 0 : i32
    %c0_i32_1 = arith.constant 0 : i32
    return %c0_i32, %c0_i32_0 : i32, i32
  }
  func.func @transform_2(%arg0: i32) -> (i32, i32) {
    %c0_i32 = arith.constant 0 : i32
    %c0_i32_0 = arith.constant 0 : i32
    %c0_i32_1 = arith.constant 0 : i32
    return %c0_i32, %c0_i32_0 : i32, i32
  }
  func.func @transform_3(%arg0: i32) -> (i32, i32, i32) {
    %c0_i32 = arith.constant 0 : i32
    %c0_i32_0 = arith.constant 0 : i32
    %c0_i32_1 = arith.constant 0 : i32
    %c0_i32_2 = arith.constant 0 : i32
    return %c0_i32, %c0_i32_0, %c0_i32_1 : i32, i32, i32
  }
  func.func @transform_4(%arg0: i32) -> (i32, i32, i32) {
    %c0_i32 = arith.constant 0 : i32
    %c0_i32_0 = arith.constant 0 : i32
    %c0_i32_1 = arith.constant 0 : i32
    %c0_i32_2 = arith.constant 0 : i32
    return %c0_i32, %c0_i32_0, %c0_i32_1 : i32, i32, i32
  }
  func.func @transform_5(%arg0: i32) -> (i32, i32) {
    %c0_i32 = arith.constant 0 : i32
    %c0_i32_0 = arith.constant 0 : i32
    %c0_i32_1 = arith.constant 0 : i32
    return %c0_i32, %c0_i32_0 : i32, i32
  }
  func.func @transform_6(%arg0: i32) -> (i32, i32) {
    %c0_i32 = arith.constant 0 : i32
    %c0_i32_0 = arith.constant 0 : i32
    %c0_i32_1 = arith.constant 0 : i32
    return %c0_i32, %c0_i32_0 : i32, i32
  }
  func.func @transform_7(%arg0: i32) -> (i32, i32) {
    %c0_i32 = arith.constant 0 : i32
    %c0_i32_0 = arith.constant 0 : i32
    return %arg0, %c0_i32 : i32, i32
  }
}

</mosaic_0001>

<bundles_post_ra>
// kernel: tpu_custom_call.1
= control target key start
LH: loop header
LB: loop body
LE: loop exit
PB: predicated region body
PF: predicated region fallthrough
CT: control target
= control target key end

     0   :  { %12 = vsyncpa [#allocation3], 0  ;;  %s1076_s0 = inlined_call_operand.hbm [shape: bf16[16,128], index: 0, kind: input, shape index: {}]   ;;  %s1077_s1 = inlined_call_operand.hbm [shape: bf16[128,128], index: 1, kind: input, shape index: {}]   ;;  %s1078_s2 = inlined_call_operand.vmem [shape: f32[1,128], index: 2, kind: input, shape index: {}]   ;;  %s1079_s3 = inlined_call_operand.hbm [shape: bf16[2,128,128], index: 3, kind: input, shape index: {}]   ;;  %s1080_s4 = inlined_call_operand.vmem [shape: f32[2,1,128], index: 4, kind: input, shape index: {}]   ;;  %s1081_s5 = inlined_call_operand.hbm [shape: bf16[128,128], index: 5, kind: input, shape index: {}]   ;;  %s1082_s6 = inlined_call_operand.vmem [shape: f32[1,128], index: 6, kind: input, shape index: {}]   ;;  %s1083_s7 = inlined_call_operand.hbm [shape: f32[16,128], index: 7, kind: output, shape index: {}]  }
   0x1   :  { %13 = vsyncpa [#allocation6], 0 }
   0x2   :  { %14 = vsyncpa [#allocation9], 0 }
   0x3   :  { %15 = vsyncpa [#allocation4], 0  ;;  %s887_s24 = smov [#allocation5]   ;;  %s888_s26 = smov [#allocation2]  }
   0x4   :  { %s33_s25 = sshll.u32 %s887_s24, 4  ;;  %s21_s27 = sshll.u32 %s888_s26, 4  ;;  %s34_s25 = int_to_ptr.vmem [resolvable:$true] %s33_s25  ;;  %s938_s27 = int_to_ptr.vmem [resolvable:$true] %s21_s27 }
   0x5   :  { %s769_s30 = scalar_lea.hbm %s1077_s1, 1024 }
   0x6   :  { %p770_p0 = scmp.ne.s32.totalorder %s1077_s1, %s769_s30  ;;  %p773_p1 = scmp.lt.u32.totalorder %s769_s30, %s1077_s1 }
   0x8   :  { %p775_p2 = pnand %p773_p1, %p770_p0 }
   0xa   :  { %778 = shalt.err (!%p775_p2)
}
   0xb   :  { %s779_s12 = scalar_lea.vmem %s34_s25, 1024  ;;  %p784_p4 = scmp.lt.s32.totalorder %s34_s25, %s34_s25 }
   0xc   :  { %p780_p3 = scmp.ne.s32.totalorder %s34_s25, %s779_s12  ;;  %p785_p5 = scmp.lt.s32.totalorder %s779_s12, %s779_s12 }
   0xe   :  { %p786_p6 = por %p785_p5, %p784_p4 }
  0x10   :  { %p787_p7 = pnand %p786_p6, %p780_p3 }
  0x12   :  { %790 = shalt.err (!%p787_p7)
}
  0x13   :  { %s889_s13 = smov 64   ;;  %s890_s14 = smov 4  }
  0x14   :  { %39 = dma.hbm_to_vmem [thread:$0]  %s1077_s1, 1024, %s34_s25, [#allocation6], %s889_s13, %s889_s13, %s890_s14  }
  0x15   :  { %s791_s19 = scalar_lea.hbm %s1076_s0, 128 }
  0x16   :  { %p792_p8 = scmp.ne.s32.totalorder %s1076_s0, %s791_s19  ;;  %p795_p9 = scmp.lt.u32.totalorder %s791_s19, %s1076_s0 }
  0x18   :  { %p797_p10 = pnand %p795_p9, %p792_p8 }
  0x1a   :  { %800 = shalt.err (!%p797_p10)
}
  0x1b   :  { %s801_s24 = scalar_lea.vmem %s938_s27, 128  ;;  %p806_p12 = scmp.lt.s32.totalorder %s938_s27, %s938_s27 }
  0x1c   :  { %p802_p11 = scmp.ne.s32.totalorder %s938_s27, %s801_s24  ;;  %p807_p13 = scmp.lt.s32.totalorder %s801_s24, %s801_s24 }
  0x1e   :  { %p808_p0 = por %p807_p13, %p806_p12 }
  0x20   :  { %p809_p1 = pnand %p808_p0, %p802_p11 }
  0x22   :  { %812 = shalt.err (!%p809_p1)
}
  0x23   :  { %27 = dma.hbm_to_vmem [thread:$0]  %s1076_s0, 128, %s938_s27, [#allocation3], %s889_s13, %s889_s13, %s890_s14  }
  0x24   :  { %s891_s26 = smov [#allocation7]   ;;  %s892_s29 = smov [#allocation8]  }
  0x25   :  { %s47_s28 = sshll.u32 %s891_s26, 4  ;;  %s61_s30 = sshll.u32 %s892_s29, 4  ;;  %s48_s28 = int_to_ptr.vmem [resolvable:$true] %s47_s28  ;;  %s975_s30 = int_to_ptr.vmem [resolvable:$true] %s61_s30 }
  0x26   :  { %s813_s10 = scalar_lea.hbm %s1079_s3, 2048 }
  0x27   :  { %p814_p2 = scmp.ne.s32.totalorder %s1079_s3, %s813_s10  ;;  %p817_p3 = scmp.lt.u32.totalorder %s813_s10, %s1079_s3 }
  0x29   :  { %p819_p4 = pnand %p817_p3, %p814_p2 }
  0x2b   :  { %822 = shalt.err (!%p819_p4)
}
  0x2c   :  { %s823_s0 = scalar_lea.vmem %s48_s28, 2048  ;;  %p828_p6 = scmp.lt.s32.totalorder %s48_s28, %s48_s28 }
  0x2d   :  { %p824_p5 = scmp.ne.s32.totalorder %s48_s28, %s823_s0  ;;  %p829_p7 = scmp.lt.s32.totalorder %s823_s0, %s823_s0 }
  0x2f   :  { %p830_p8 = por %p829_p7, %p828_p6 }
  0x31   :  { %p831_p9 = pnand %p830_p8, %p824_p5 }
  0x33   :  { %834 = shalt.err (!%p831_p9)
}
  0x34   :  { %53 = dma.hbm_to_vmem [thread:$0]  %s1079_s3, 2048, %s48_s28, [#allocation6], %s889_s13, %s889_s13, %s890_s14  }
  0x35   :  { %s835_s20 = scalar_lea.hbm %s1081_s5, 1024 }
  0x36   :  { %p836_p10 = scmp.ne.s32.totalorder %s1081_s5, %s835_s20  ;;  %p839_p11 = scmp.lt.u32.totalorder %s835_s20, %s1081_s5 }
  0x38   :  { %p841_p12 = pnand %p839_p11, %p836_p10 }
  0x3a   :  { %844 = shalt.err (!%p841_p12)
}
  0x3b   :  { %s845_s1 = scalar_lea.vmem %s975_s30, 1024  ;;  %p850_p0 = scmp.lt.s32.totalorder %s975_s30, %s975_s30 }
  0x3c   :  { %p846_p13 = scmp.ne.s32.totalorder %s975_s30, %s845_s1  ;;  %p851_p1 = scmp.lt.s32.totalorder %s845_s1, %s845_s1 }
  0x3e   :  { %p852_p2 = por %p851_p1, %p850_p0 }
  0x40   :  { %p853_p3 = pnand %p852_p2, %p846_p13 }
  0x42   :  { %856 = shalt.err (!%p853_p3)
}
  0x43   :  { %67 = dma.hbm_to_vmem [thread:$0]  %s1081_s5, 1024, %s975_s30, [#allocation9], %s889_s13, %s889_s13, %s890_s14  }
  0x44   :  { %879 = dma.done.wait [#allocation3], 128  }
  0x45   :  { %880 = vsyncadd [#allocation3], 4294967168 }
  0x46   :  { %881 = dma.done.wait [#allocation6], 3072  }
  0x47   :  { %882 = vsyncadd [#allocation6], 4294964224 }
  0x48   :  { %883 = dma.done.wait [#allocation9], 1024  }
  0x49   :  { %884 = vsyncadd [#allocation9], 4294966272  ;;  %v893_v0 = vmov 0.0   ;;  %vm894_vm0 = vmmov 0   ;;  %v736_v1 = vld [vmem:[#allocation5] sm:$0xff]   ;;  %v737_v2 = vld [vmem:[#allocation5 + $0x8] sm:$0xff]  }
  0x4a   :  { %645 = vmatprep.subr.bf16.mxu0 %v893_v0  ;;  %661 = vmatprep.mubr.msk.bf16.mxu0 %vm894_vm0, %v893_v0  ;;  %v738_v3 = vld [vmem:[#allocation5 + $0x10] sm:$0xff]   ;;  %v745_v4 = vld [vmem:[#allocation7] sm:$0xff]   ;;  %v739_v5 = vld [vmem:[#allocation5 + $0x18] sm:$0xff]   ;;  %s895_s8 = smov [#allocation10]  }
  0x4b   :  { %665 = vmatprep.subr.bf16.mxu1 %v893_v0  ;;  %681 = vmatprep.mubr.msk.bf16.mxu1 %vm894_vm0, %v893_v0  ;;  %v746_v6 = vld [vmem:[#allocation7 + $0x8] sm:$0xff]   ;;  %v740_v7 = vld [vmem:[#allocation5 + $0x20] sm:$0xff]   ;;  %v747_v8 = vld [vmem:[#allocation7 + $0x10] sm:$0xff]   ;;  %s557_s9 = sshll.u32 %s895_s8, 4  ;;  %s558_s9 = int_to_ptr.vmem [resolvable:$true] %s557_s9 }
  0x4c   :  { %646 = vmatpush3.bf16.msra.mxu0 %v736_v1  ;;  %666 = vmatpush3.bf16.msra.mxu1 %v745_v4  ;;  %v741_v9 = vld [vmem:[#allocation5 + $0x28] sm:$0xff]   ;;  %v748_v10 = vld [vmem:[#allocation7 + $0x18] sm:$0xff]   ;;  %v742_v11 = vld [vmem:[#allocation5 + $0x30] sm:$0xff]   ;;  %p862_p5 = scmp.lt.s32.totalorder %s558_s9, %s558_s9 }
  0x4d   :  { %647 = vmatprep.subr.bf16.mxu0 %v893_v0  ;;  %667 = vmatprep.subr.bf16.mxu1 %v893_v0  ;;  %v749_v12 = vld [vmem:[#allocation7 + $0x20] sm:$0xff]   ;;  %v743_v13 = vld [vmem:[#allocation5 + $0x38] sm:$0xff]   ;;  %v750_v14 = vld [vmem:[#allocation7 + $0x28] sm:$0xff]  }
  0x4e   :  { %v744_v15 = vld [vmem:[#allocation2] sm:$0xff]   ;;  %v751_v16 = vld [vmem:[#allocation7 + $0x30] sm:$0xff]   ;;  %v753_v18 = vld [vmem:[#allocation7 + $0x40] sm:$0xff]  }
  0x4f   :  { %v752_v17 = vld [vmem:[#allocation7 + $0x38] sm:$0xff]   ;;  %v754_v19 = vld [vmem:[#allocation7 + $0x48] sm:$0xff]   ;;  %v755_v20 = vld [vmem:[#allocation7 + $0x50] sm:$0xff]  }
  0x50   :  { %648 = vmatpush3.bf16.msra.mxu0 %v737_v2  ;;  %668 = vmatpush3.bf16.msra.mxu1 %v746_v6  ;;  %v756_v21 = vld [vmem:[#allocation7 + $0x58] sm:$0xff]   ;;  %v757_v22 = vld [vmem:[#allocation7 + $0x60] sm:$0xff]   ;;  %v758_v23 = vld [vmem:[#allocation7 + $0x68] sm:$0xff]  }
  0x51   :  { %649 = vmatprep.subr.bf16.mxu0 %v893_v0  ;;  %669 = vmatprep.subr.bf16.mxu1 %v893_v0  ;;  %v571_v24 = vld [vmem:[%s1078_s2] ss:$0 sm:$0xff]  ;;  %v759_v34 = vld [vmem:[#allocation7 + $0x70] sm:$0xff]   ;;  %v761_v36 = vld [vmem:[#allocation8] sm:$0xff]  }
  0x52   :  { %v760_v35 = vld [vmem:[#allocation7 + $0x78] sm:$0xff]   ;;  %v762_v37 = vld [vmem:[#allocation8 + $0x8] sm:$0xff]   ;;  %v763_v38 = vld [vmem:[#allocation8 + $0x10] sm:$0xff]  }
  0x53   :  { %v764_v39 = vld [vmem:[#allocation8 + $0x18] sm:$0xff]   ;;  %v765_v40 = vld [vmem:[#allocation8 + $0x20] sm:$0xff]   ;;  %v766_v41 = vld [vmem:[#allocation8 + $0x28] sm:$0xff]  }
  0x54   :  { %650 = vmatpush3.bf16.msra.mxu0 %v738_v3  ;;  %670 = vmatpush3.bf16.msra.mxu1 %v747_v8  ;;  %v581_v42 = vld [vmem:[%s1080_s4] ss:$0 sm:$0xff]  ;;  %v767_v52 = vld [vmem:[#allocation8 + $0x30] sm:$0xff]   ;;  %v591_v54 = vld [vmem:[%s1080_s4 + $0x1] ss:$0 sm:$0xff]  ;;  %s857_s4 = scalar_lea.vmem %s558_s9, 256 }
  0x55   :  { %651 = vmatprep.subr.bf16.mxu0 %v893_v0  ;;  %671 = vmatprep.subr.bf16.mxu1 %v893_v0  ;;  %v768_v53 = vld [vmem:[#allocation8 + $0x38] sm:$0xff]   ;;  %p858_p4 = scmp.ne.s32.totalorder %s558_s9, %s857_s4  ;;  %p863_p6 = scmp.lt.s32.totalorder %s857_s4, %s857_s4 }
  0x57   :  { %p864_p7 = por %p863_p6, %p862_p5 }
  0x58   :  { %652 = vmatpush3.bf16.msra.mxu0 %v739_v5  ;;  %672 = vmatpush3.bf16.msra.mxu1 %v748_v10 }
  0x59   :  { %653 = vmatprep.subr.bf16.mxu0 %v893_v0  ;;  %673 = vmatprep.subr.bf16.mxu1 %v893_v0  ;;  %p865_p8 = pnand %p864_p7, %p858_p4 }
  0x5c   :  { %654 = vmatpush3.bf16.msra.mxu0 %v740_v7  ;;  %674 = vmatpush3.bf16.msra.mxu1 %v749_v12 }
  0x5d   :  { %655 = vmatprep.subr.bf16.mxu0 %v893_v0  ;;  %675 = vmatprep.subr.bf16.mxu1 %v893_v0 }
  0x60   :  { %656 = vmatpush3.bf16.msra.mxu0 %v741_v9  ;;  %676 = vmatpush3.bf16.msra.mxu1 %v750_v14 }
  0x61   :  { %657 = vmatprep.subr.bf16.mxu0 %v893_v0  ;;  %677 = vmatprep.subr.bf16.mxu1 %v893_v0 }
  0x64   :  { %658 = vmatpush3.bf16.msra.mxu0 %v742_v11  ;;  %678 = vmatpush3.bf16.msra.mxu1 %v751_v16 }
  0x65   :  { %659 = vmatprep.subr.bf16.mxu0 %v893_v0  ;;  %679 = vmatprep.subr.bf16.mxu1 %v893_v0 }
  0x68   :  { %660 = vmatpush3.bf16.msra.mxu0 %v743_v13  ;;  %680 = vmatpush3.bf16.msra.mxu1 %v752_v17 }
  0x69   :  { %685 = vmatprep.subr.bf16.mxu0 %v893_v0  ;;  %705 = vmatprep.subr.bf16.mxu1 %v893_v0 }
  0x6b   :  { %662 = vmatmul.mubr.bf16.vlgmr.msra.gmra.mrb[0].mxu0 %v744_v15 }
  0x6c   :  { %701 = vmatprep.mubr.msk.bf16.mxu0 %vm894_vm0, %v893_v0  ;;  %686 = vmatpush3.bf16.msra.mxu0 %v753_v18 }
  0x6d   :  { %687 = vmatprep.subr.bf16.mxu0 %v893_v0 }
  0x70   :  { %688 = vmatpush3.bf16.msra.mxu0 %v754_v19 }
  0x71   :  { %689 = vmatprep.subr.bf16.mxu0 %v893_v0 }
  0x74   :  { %690 = vmatpush3.bf16.msra.mxu0 %v755_v20 }
  0x75   :  { %691 = vmatprep.subr.bf16.mxu0 %v893_v0 }
  0x78   :  { %692 = vmatpush3.bf16.msra.mxu0 %v756_v21 }
  0x79   :  { %693 = vmatprep.subr.bf16.mxu0 %v893_v0 }
  0x7c   :  { %694 = vmatpush3.bf16.msra.mxu0 %v757_v22 }
  0x7d   :  { %695 = vmatprep.subr.bf16.mxu0 %v893_v0 }
  0x80   :  { %696 = vmatpush3.bf16.msra.mxu0 %v758_v23 }
  0x81   :  { %697 = vmatprep.subr.bf16.mxu0 %v893_v0 }
  0x84   :  { %698 = vmatpush3.bf16.msra.mxu0 %v759_v34 }
  0x85   :  { %699 = vmatprep.subr.bf16.mxu0 %v893_v0 }
  0x88   :  { %700 = vmatpush3.bf16.msra.mxu0 %v760_v35 }
 0x13e   :  { %v196_v25 = vpop.f32.mrb[0].mxu0 }
 0x13f   :  { %v197_v26 = vadd.f32 %v571_v24, %v196_v25  ;;  %v663_v27 = vpop.f32.mrb[1].mxu0 }
 0x140   :  { %v199_v28 = vpop.f32.mrb[2].mxu0 }
 0x141   :  { %v200_v29 = vadd.f32 %v571_v24, %v199_v28  ;;  %v664_v30 = vpop.f32.mrb[3].mxu0  ;;  %v203_v31 = vmax.f32 %v197_v26, 0.0 }
 0x143   :  { %v204_v32 = vmax.f32 %v200_v29, 0.0 }
 0x145   :  { %v205_v33 = vpack.c.bf16 %v204_v32, %v203_v31 }
 0x147   :  { %682 = vmatmul.mubr.bf16.vlgmr.msra.gmra.mrb[0].mxu1 %v205_v33 }
 0x148   :  { %721 = vmatprep.mubr.msk.bf16.mxu1 %vm894_vm0, %v893_v0  ;;  %706 = vmatpush3.bf16.msra.mxu1 %v761_v36 }
 0x149   :  { %707 = vmatprep.subr.bf16.mxu1 %v893_v0 }
 0x14c   :  { %708 = vmatpush3.bf16.msra.mxu1 %v762_v37 }
 0x14d   :  { %709 = vmatprep.subr.bf16.mxu1 %v893_v0 }
 0x150   :  { %710 = vmatpush3.bf16.msra.mxu1 %v763_v38 }
 0x151   :  { %711 = vmatprep.subr.bf16.mxu1 %v893_v0 }
 0x154   :  { %712 = vmatpush3.bf16.msra.mxu1 %v764_v39 }
 0x155   :  { %713 = vmatprep.subr.bf16.mxu1 %v893_v0 }
 0x158   :  { %714 = vmatpush3.bf16.msra.mxu1 %v765_v40 }
 0x159   :  { %715 = vmatprep.subr.bf16.mxu1 %v893_v0 }
 0x15c   :  { %716 = vmatpush3.bf16.msra.mxu1 %v766_v41 }
 0x15d   :  { %717 = vmatprep.subr.bf16.mxu1 %v893_v0 }
 0x160   :  { %718 = vmatpush3.bf16.msra.mxu1 %v767_v52 }
 0x161   :  { %719 = vmatprep.subr.bf16.mxu1 %v893_v0  ;;  %v600_v0 = vld [vmem:[%s1082_s6] ss:$0 sm:$0xff] }
 0x164   :  { %720 = vmatpush3.bf16.msra.mxu1 %v768_v53 }
 0x21a   :  { %v311_v43 = vpop.f32.mrb[0].mxu1 }
 0x21b   :  { %v312_v44 = vadd.f32 %v581_v42, %v311_v43  ;;  %v683_v45 = vpop.f32.mrb[1].mxu1 }
 0x21c   :  { %v314_v46 = vpop.f32.mrb[2].mxu1 }
 0x21d   :  { %v315_v47 = vadd.f32 %v581_v42, %v314_v46  ;;  %v684_v48 = vpop.f32.mrb[3].mxu1  ;;  %v318_v49 = vmax.f32 %v312_v44, 0.0 }
 0x21f   :  { %v319_v50 = vmax.f32 %v315_v47, 0.0 }
 0x221   :  { %v320_v51 = vpack.c.bf16 %v319_v50, %v318_v49 }
 0x223   :  { %702 = vmatmul.mubr.bf16.vlgmr.msra.gmra.mrb[4].mxu0 %v320_v51 }
 0x2f6   :  { %v428_v55 = vpop.f32.mrb[4].mxu0 }
 0x2f7   :  { %v429_v56 = vadd.f32 %v591_v54, %v428_v55  ;;  %v703_v57 = vpop.f32.mrb[5].mxu0 }
 0x2f8   :  { %v431_v58 = vpop.f32.mrb[6].mxu0 }
 0x2f9   :  { %v432_v59 = vadd.f32 %v591_v54, %v431_v58  ;;  %v704_v60 = vpop.f32.mrb[7].mxu0  ;;  %v435_v61 = vmax.f32 %v429_v56, 0.0 }
 0x2fb   :  { %v436_v62 = vmax.f32 %v432_v59, 0.0 }
 0x2fd   :  { %v437_v63 = vpack.c.bf16 %v436_v62, %v435_v61 }
 0x2ff   :  { %722 = vmatmul.mubr.bf16.vlgmr.msra.gmra.mrb[4].mxu1 %v437_v63 }
 0x3d2   :  { %v543_v1 = vpop.f32.mrb[4].mxu1 }
 0x3d3   :  { %v544_v2 = vadd.f32 %v600_v0, %v543_v1  ;;  %v723_v3 = vpop.f32.mrb[5].mxu1 }
 0x3d4   :  { %v546_v4 = vpop.f32.mrb[6].mxu1 }
 0x3d5   :  { %550 = vst [vmem:[#allocation10] sm:$0xff] %v544_v2  ;;  %v547_v5 = vadd.f32 %v600_v0, %v546_v4  ;;  %v724_v6 = vpop.f32.mrb[7].mxu1 }
 0x3d7   :  { %551 = vst [vmem:[#allocation10 + $0x8] sm:$0xff] %v547_v5 }
 0x3d8   :  { %868 = shalt.err (!%p865_p8)
}
 0x3d9   :  { %s869_s11 = scalar_lea.hbm %s1083_s7, 256 }
 0x3da   :  { %p870_p9 = scmp.ne.s32.totalorder %s1083_s7, %s869_s11  ;;  %p873_p10 = scmp.lt.u32.totalorder %s869_s11, %s1083_s7 }
 0x3dc   :  { %p875_p11 = pnand %p873_p10, %p870_p9 }
 0x3de   :  { %878 = shalt.err (!%p875_p11)
}
 0x3df   :  { %s896_s27 = smov 128   ;;  %s897_s17 = smov 8  }
 0x3e0   :  { %563 = dma.vmem_to_hbm [thread:$0]  %s558_s9, 256, %s1083_s7, [#allocation4], %s896_s27, %s896_s27, %s897_s17  }
 0x3e1   :  { %885 = dma.done.wait [#allocation4], 256  }
 0x3e2   :  { %886 = vsyncadd [#allocation4], 4294967040 }
 0x3e3   :  { %567 = vsyncpa [#allocation3], 1 }
 0x3e4   :  { %568 = vsyncpa [#allocation6], 1 }
 0x3e5   :  { %569 = vsyncpa [#allocation9], 1 }
 0x3e6   :  { %570 = vsyncpa [#allocation4], 1 }

</bundles_post_ra>
